<compile_context>
chip_gen: v7x
topology: tpu7x:2x2x1
jax: 0.10.0
libtpu: 0.0.40
codegen_flags: <defaults>
</compile_context>

<pallas_src>
import functools

import jax
import jax.numpy as jnp
from jax.experimental import pallas as pl
from jax.experimental.pallas import tpu as pltpu


def _round_up(x, m):
    return (x + m - 1) // m * m


_PAD_ROW = jnp.iinfo(jnp.int32).min          # sentinel label for padded anchor rows
_PAD_COL = jnp.iinfo(jnp.int32).min + 1      # sentinel label for padded contrast cols


def _fscl_kernel(a_ref, ct_ref, rlab_ref, rsen_ref, clab_ref, csen_ref, ginv_ref,
                 loss_ref,
                 m_ref, s_ref, sp_ref, cnt_ref, ms_ref, *,
                 inv_temperature, loss_coef, method, group_norm, c_const,
                 nc_real, col_padded):
    f32 = jnp.float32
    tm = a_ref.shape[0]
    tn = ct_ref.shape[1]
    i = pl.program_id(0)
    j = pl.program_id(1)

    # ---- init per-row online accumulators at the first column block ----
    @pl.when(j == 0)
    def _init():
        m_ref[...] = jnp.full(m_ref.shape, -jnp.inf, f32)
        s_ref[...] = jnp.zeros(s_ref.shape, f32)
        sp_ref[...] = jnp.zeros(sp_ref.shape, f32)
        cnt_ref[...] = jnp.zeros(cnt_ref.shape, f32)
        ms_ref[...] = jnp.zeros(ms_ref.shape, f32)

    # ---- logits tile on the MXU (contrast pre-transposed: A[M,K] @ Ct[K,N]) ----
    adc = jax.lax.dot_general(
        a_ref[...], ct_ref[...],
        dimension_numbers=(((1,), (0,)), ((), ())),
        preferred_element_type=f32) * inv_temperature               # [TM, TN]

    # ---- masks rebuilt from label vectors: one broadcasted compare per mask ----
    row_idx = i * tm + jax.lax.broadcasted_iota(jnp.int32, (tm, 1), 0)   # [TM, 1]
    col_idx = j * tn + jax.lax.broadcasted_iota(jnp.int32, (1, tn), 1)   # [1, TN]
    not_self = row_idx != col_idx                                        # [TM, TN]
    if col_padded:
        valid_col = col_idx < nc_real
        not_self = not_self & valid_col
    same_lab = rlab_ref[...] == clab_ref[...]                            # [TM, TN]
    pos = same_lab & not_self

    need_sen = (group_norm == 1) or (method in ("FSCL", "FSCL*"))
    same_sen = (rsen_ref[...] == csen_ref[...]) if need_sen else None

    if method == "FSCL":
        den_sel = not_self & jnp.logical_not(same_lab) & same_sen
    elif method == "FSCL*":
        den_sel = not_self & same_sen
    else:                                   # SupCon / SimCLR
        den_sel = not_self

    # ---- online max + rescaled masked exp-sum (flash-style) ----
    m_prev = m_ref[...]
    if col_padded:
        adc_for_max = jnp.where(valid_col, adc, -jnp.inf)
    else:
        adc_for_max = adc
    m_new = jnp.maximum(m_prev, jnp.max(adc_for_max, axis=1, keepdims=True))
    alpha = jnp.exp(m_prev - m_new)                  # exp(-inf) = 0 on the first step
    e = jnp.exp(adc - m_new)
    s_ref[...] = alpha * s_ref[...] + jnp.sum(jnp.where(den_sel, e, 0.0),
                                              axis=1, keepdims=True)
    m_ref[...] = m_new

    # ---- accumulate positive-pair statistics (independent of the running max) ----
    if group_norm == 1:
        w = jnp.where(pos, ginv_ref[...], 0.0)       # column-indexed 1/denominator
        sp_ref[...] += jnp.sum(w * adc, axis=1, keepdims=True)
        cnt_ref[...] += jnp.sum(w, axis=1, keepdims=True)
        ms_ref[...] += jnp.sum((pos & same_sen).astype(f32), axis=1, keepdims=True)
    else:
        pos_f = pos.astype(f32)
        sp_ref[...] += jnp.sum(pos_f * adc, axis=1, keepdims=True)
        cnt_ref[...] += jnp.sum(pos_f, axis=1, keepdims=True)

    # ---- finalize per-row losses after the last column block ----
    @pl.when(j == pl.num_programs(1) - 1)
    def _finish():
        s = s_ref[...]
        log_s = jnp.log(s + (s == 0.0).astype(f32))  # torch's empty-denominator guard
        shift = m_ref[...] + log_s                   # [TM, 1]
        cnt = cnt_ref[...]
        if group_norm == 1:
            mean_lp = sp_ref[...] - cnt * shift
            loss = (loss_coef * mean_lp) * (c_const / (ms_ref[...] + 1.0))
        else:
            mean_lp = (sp_ref[...] - cnt * shift) / cnt
            loss = loss_coef * mean_lp
        # padded anchor rows -> 0 (prevents NaN in the output buffer); real rows keep
        # the reference's 0/0 semantics for degenerate positive-free rows.
        valid_row = rlab_ref[...] != _PAD_ROW
        loss_ref[...] = jnp.where(valid_row, loss, 0.0)


def _vmem_limit_bytes():
    # Generation-aware VMEM budget: ~75% of per-core VMEM, capped at 96 MiB.
    try:
        cap = int(pltpu.get_tpu_info().vmem_capacity_bytes)
        return min(cap * 3 // 4, 96 * 1024 * 1024)
    except Exception:
        return 48 * 1024 * 1024


def fair_supcon_loss(features, labels, sensitive_labels, group_norm, method, *,
                     temperature=0.07, contrast_mode="all", base_temperature=0.07,
                     block_rows=256, block_cols=512, matmul_dtype=jnp.bfloat16):
    """JAX/Pallas port of FairSupConLoss.forward (labels path).

    matmul_dtype=jnp.bfloat16 (default) uses the native bf16 MXU rate with f32
    accumulation; pass jnp.float32 for bit-faithful numerics vs the PyTorch module.
    """
    if features.ndim < 3:
        raise ValueError("`features` needs to be [bsz, n_views, ...]")
    if method not in ("FSCL", "FSCL*", "SupCon", "SimCLR"):
        raise ValueError(f"Unknown method: {method}")
    bsz, n_views = features.shape[0], features.shape[1]
    feats = features.reshape(bsz, n_views, -1).astype(jnp.float32)

    # contrast_feature = cat(unbind(features, dim=1), dim=0)  -> view-major rows
    contrast_count = n_views
    contrast_feature = jnp.concatenate([feats[:, v] for v in range(n_views)], axis=0)
    if contrast_mode == "one":
        anchor_feature, anchor_count = feats[:, 0], 1
    elif contrast_mode == "all":
        anchor_feature, anchor_count = contrast_feature, contrast_count
    else:
        raise ValueError(f"Unknown mode: {contrast_mode}")

    labels = jnp.asarray(labels).reshape(-1).astype(jnp.int32)
    sens = jnp.asarray(sensitive_labels).reshape(-1).astype(jnp.int32)
    if labels.shape[0] != bsz:
        raise ValueError("Num of labels does not match num of features")
    # FSCL*/SimCLR use an identity positive mask == "every sample is its own class".
    eff_labels = labels if method in ("FSCL", "SupCon") else jnp.arange(bsz, dtype=jnp.int32)

    NA = anchor_count * bsz
    NC = contrast_count * bsz
    D = anchor_feature.shape[-1]

    # ---- tile sizes ----
    D_pad = max(256, _round_up(D, 256))                  # full MXU K passes on v6e/v7x
    TM = min(int(block_rows), _round_up(NA, 8))
    if NA > 8:                                           # >=2 row blocks for v7x megacore
        TM = min(TM, _round_up((NA + 1) // 2, 8))
    TM = _round_up(max(TM, 8), 8)
    NA_pad = _round_up(NA, TM)
    TN = _round_up(max(min(int(block_cols), _round_up(NC, 128)), 128), 128)
    NC_pad = _round_up(NC, TN)

    def pad2(x, rows, cols):
        return jnp.pad(x, ((0, rows - x.shape[0]), (0, cols - x.shape[1])))

    a = pad2(anchor_feature, NA_pad, D_pad).astype(matmul_dtype)
    # pre-transpose the contrast once in XLA -> MXU-native [K, N] RHS in the kernel
    c_t = pad2(contrast_feature, NC_pad, D_pad).astype(matmul_dtype).T

    row_lab = jnp.full((NA_pad,), _PAD_ROW, jnp.int32).at[:NA].set(
        jnp.tile(eff_labels, anchor_count)).reshape(NA_pad, 1)
    row_sen = jnp.full((NA_pad,), _PAD_ROW, jnp.int32).at[:NA].set(
        jnp.tile(sens, anchor_count)).reshape(NA_pad, 1)
    col_lab = jnp.full((NC_pad,), _PAD_COL, jnp.int32).at[:NC].set(
        jnp.tile(eff_labels, contrast_count)).reshape(1, NC_pad)
    col_sen = jnp.full((NC_pad,), _PAD_COL, jnp.int32).at[:NC].set(
        jnp.tile(sens, contrast_count)).reshape(1, NC_pad)

    if int(group_norm) == 1:
        if contrast_mode != "all":
            # torch itself cannot broadcast the [NA] denominator onto [NA, NC] here.
            raise ValueError("group_norm=1 requires contrast_mode='all'")
        # per-column denominator (mask*smask).sum(1)[col] = contrast_count * |same
        # (label, sensitive) group of base sample col % bsz| - 1 (self removed).
        base_ms = ((eff_labels[:, None] == eff_labels[None, :]) &
                   (sens[:, None] == sens[None, :])).astype(jnp.float32)
        d_base = contrast_count * base_ms.sum(axis=1) - 1.0
        ginv = jnp.zeros((NC_pad,), jnp.float32).at[:NC].set(
            1.0 / jnp.tile(d_base, contrast_count)).reshape(1, NC_pad)
    else:
        ginv = jnp.zeros((1, NC_pad), jnp.float32)

    kernel = functools.partial(
        _fscl_kernel,
        inv_temperature=float(1.0 / temperature),
        loss_coef=float(-(temperature / base_temperature)),
        method=method,
        group_norm=int(group_norm),
        c_const=float(NA) / 8.0,                         # loss.size(0) / 8 in torch
        nc_real=int(NC),
        col_padded=bool(NC_pad != NC))

    out = pl.pallas_call(
        kernel,
        out_shape=jax.ShapeDtypeStruct((NA_pad, 1), jnp.float32),
        grid=(NA_pad // TM, NC_pad // TN),
        in_specs=[
            pl.BlockSpec((TM, D_pad), lambda i, j: (i, 0)),    # anchor row block
            pl.BlockSpec((D_pad, TN), lambda i, j: (0, j)),    # contrast^T column block
            pl.BlockSpec((TM, 1), lambda i, j: (i, 0)),        # row labels
            pl.BlockSpec((TM, 1), lambda i, j: (i, 0)),        # row sensitive labels
            pl.BlockSpec((1, TN), lambda i, j: (0, j)),        # column labels
            pl.BlockSpec((1, TN), lambda i, j: (0, j)),        # column sensitive labels
            pl.BlockSpec((1, TN), lambda i, j: (0, j)),        # 1/group-norm denominators
        ],
        out_specs=pl.BlockSpec((TM, 1), lambda i, j: (i, 0)),
        scratch_shapes=[pltpu.VMEM((TM, 1), jnp.float32) for _ in range(5)],
        compiler_params=pltpu.CompilerParams(
            dimension_semantics=("parallel", "arbitrary"),
            vmem_limit_bytes=_vmem_limit_bytes()),
    )(a, c_t, row_lab, row_sen, col_lab, col_sen, ginv)

    # loss.view(anchor_count, batch_size).mean() == mean over the NA real rows
    return jnp.mean(out[:NA, 0])

    # TODO(synk): the `labels is None` / externally supplied `mask=` paths of the
    # PyTorch module are not implemented (only the labels path, as in training).


# ---------------- pure-JAX reference (mirrors the PyTorch code) ----------------
def _reference(features, labels, sensitive_labels, group_norm, method,
               temperature=0.07, base_temperature=0.07, contrast_mode="all"):
    bsz, n_views = features.shape[0], features.shape[1]
    feats = features.reshape(bsz, n_views, -1).astype(jnp.float32)
    cf = jnp.concatenate([feats[:, v] for v in range(n_views)], axis=0)
    contrast_count = n_views
    if contrast_mode == "one":
        anchor, anchor_count = feats[:, 0], 1
    else:
        anchor, anchor_count = cf, contrast_count
    labels = labels.reshape(-1, 1)
    sens = sensitive_labels.reshape(-1, 1)
    base_mask = (labels == labels.T).astype(jnp.float32)
    if method in ("FSCL*", "SimCLR"):
        base_mask = jnp.eye(bsz, dtype=jnp.float32)
    smask_b = (sens == sens.T).astype(jnp.float32)
    adc = (anchor @ cf.T) / temperature
    logits = adc - jnp.max(adc, axis=1, keepdims=True)
    mask = jnp.tile(base_mask, (anchor_count, contrast_count))
    smask = jnp.tile(smask_b, (anchor_count, contrast_count))
    NA, NC = bsz * anchor_count, bsz * contrast_count
    lmask = jnp.ones((NA, NC), jnp.float32).at[jnp.arange(NA), jnp.arange(NA)].set(0.0)
    mask = mask * lmask
    if method in ("FSCL", "FSCL*"):
        if method == "FSCL":
            lmf = lmask * (mask == 0.0).astype(jnp.float32) * smask
        else:
            lmf = lmask * smask
        s = (jnp.exp(logits) * lmf).sum(1, keepdims=True)
        log_prob = logits - jnp.log(s + (s == 0.0).astype(jnp.float32))
    else:
        log_prob = logits - jnp.log((jnp.exp(logits) * lmask).sum(1, keepdims=True))
    if group_norm == 1:
        mean_lp = (mask * log_prob / (mask * smask).sum(1)).sum(1)
    else:
        mean_lp = (mask * log_prob).sum(1) / mask.sum(1)
    loss = -(temperature / base_temperature) * mean_lp
    if group_norm == 1:
        C = loss.shape[0] / 8.0
        loss = loss * (1.0 / ((mask * smask).sum(1) + 1.0)) * C
    return loss.reshape(anchor_count, bsz).mean()


if __name__ == "__main__":
    key = jax.random.PRNGKey(0)
    k1, k2, k3, k4 = jax.random.split(key, 4)

    # small case: batch=8, 2 views, dim=32
    bsz, n_views, dim = 8, 2, 32
    features = jax.random.normal(k1, (bsz, n_views, dim), dtype=jnp.float32)
    features = features / jnp.linalg.norm(features, axis=-1, keepdims=True)
    # every (label, sensitive) pair appears >= twice so group_norm denominators are safe
    labels = jnp.array([0, 0, 1, 1, 0, 1, 0, 1], dtype=jnp.int32)
    sensitive = jnp.array([0, 0, 1, 1, 0, 1, 0, 1], dtype=jnp.int32)

    cases = [("FSCL", 0), ("FSCL", 1), ("SupCon", 0), ("SupCon", 1),
             ("FSCL*", 0), ("SimCLR", 0)]
    for method, gn in cases:
        out = jax.block_until_ready(fair_supcon_loss(
            features, labels, sensitive, gn, method, matmul_dtype=jnp.float32))
        ref = _reference(features, labels, sensitive, gn, method)
        assert jnp.allclose(out, ref, rtol=1e-4, atol=1e-5), (method, gn, float(out), float(ref))

    # forced small row tile (row grid > 1 exercises program_id-based diagonal masking)
    out = jax.block_until_ready(fair_supcon_loss(
        features, labels, sensitive, 1, "FSCL", block_rows=8, matmul_dtype=jnp.float32))
    ref = _reference(features, labels, sensitive, 1, "FSCL")
    assert jnp.allclose(out, ref, rtol=1e-4, atol=1e-5), ("FSCL-tiled", float(out), float(ref))

    # contrast_mode='one'
    out = jax.block_until_ready(fair_supcon_loss(
        features, labels, sensitive, 0, "SupCon", contrast_mode="one",
        matmul_dtype=jnp.float32))
    ref = _reference(features, labels, sensitive, 0, "SupCon", contrast_mode="one")
    assert jnp.allclose(out, ref, rtol=1e-4, atol=1e-5), ("SupCon-one", float(out), float(ref))

    # default bf16 MXU path (looser tolerance vs the f32 reference)
    out = jax.block_until_ready(fair_supcon_loss(features, labels, sensitive, 0, "FSCL"))
    ref = _reference(features, labels, sensitive, 0, "FSCL")
    assert jnp.allclose(out, ref, rtol=5e-2, atol=5e-2), ("FSCL-bf16", float(out), float(ref))

    # larger case: multiple row AND column blocks -> exercises the online softmax
    bsz2, dim2 = 160, 96
    f2 = jax.random.normal(k2, (bsz2, 2, dim2), dtype=jnp.float32)
    f2 = f2 / jnp.linalg.norm(f2, axis=-1, keepdims=True)
    lab2 = jax.random.randint(k3, (bsz2,), 0, 3, dtype=jnp.int32)
    sen2 = jax.random.randint(k4, (bsz2,), 0, 2, dtype=jnp.int32)
    for method, gn in [("FSCL", 1), ("SupCon", 0), ("FSCL*", 0)]:
        out = jax.block_until_ready(fair_supcon_loss(
            f2, lab2, sen2, gn, method, block_cols=128, matmul_dtype=jnp.float32))
        ref = _reference(f2, lab2, sen2, gn, method)
        assert jnp.allclose(out, ref, rtol=2e-4, atol=2e-4), (method, gn, float(out), float(ref))

    print("KERNEL_OK")
</pallas_src>

<mosaic_0001>
module attributes {stable_mosaic.version = 11 : i64} {
  func.func @_fscl_kernel(%arg0: i32, %arg1: i32, %arg2: memref<8x256xf32, #tpu.memory_space<vmem>>, %arg3: memref<256x128xf32, #tpu.memory_space<vmem>>, %arg4: memref<8x1xi32, #tpu.memory_space<vmem>>, %arg5: memref<8x1xi32, #tpu.memory_space<vmem>>, %arg6: memref<1x128xi32, #tpu.memory_space<vmem>>, %arg7: memref<1x128xi32, #tpu.memory_space<vmem>>, %arg8: memref<1x128xf32, #tpu.memory_space<vmem>>, %arg9: memref<8x1xf32, #tpu.memory_space<vmem>>, %arg10: memref<8x1xf32, #tpu.memory_space<vmem>>, %arg11: memref<8x1xf32, #tpu.memory_space<vmem>>, %arg12: memref<8x1xf32, #tpu.memory_space<vmem>>, %arg13: memref<8x1xf32, #tpu.memory_space<vmem>>, %arg14: memref<8x1xf32, #tpu.memory_space<vmem>>) attributes {dimension_semantics = [#tpu.dimension_semantics<parallel>, #tpu.dimension_semantics<arbitrary>], iteration_bounds = array<i64: 2, 1>, scalar_prefetch = 0 : i64, scratch_operands = 5 : i64, tpu.core_type = #tpu.core_type<tc>, window_params = [{transform_indices = @transform_0, window_bounds = array<i64: 8, 256>}, {transform_indices = @transform_1, window_bounds = array<i64: 256, 128>}, {transform_indices = @transform_2, window_bounds = array<i64: 8, 1>}, {transform_indices = @transform_3, window_bounds = array<i64: 8, 1>}, {transform_indices = @transform_4, window_bounds = array<i64: 1, 128>}, {transform_indices = @transform_5, window_bounds = array<i64: 1, 128>}, {transform_indices = @transform_6, window_bounds = array<i64: 1, 128>}, {transform_indices = @transform_7, window_bounds = array<i64: 8, 1>}]} {
    %c0_i32 = arith.constant 0 : i32
    %0 = arith.cmpi eq, %arg1, %c0_i32 : i32
    %1 = arith.extui %0 : i1 to i32
    %c0_i32_0 = arith.constant 0 : i32
    %2 = arith.cmpi ne, %1, %c0_i32_0 : i32
    scf.if %2 {
      %cst_38 = arith.constant 0xFF800000 : f32
      %75 = vector.broadcast %cst_38 : f32 to vector<8x1xf32>
      %c0_39 = arith.constant 0 : index
      %c0_40 = arith.constant 0 : index
      %76 = vector.load %arg10[%c0_39, %c0_40] : memref<8x1xf32, #tpu.memory_space<vmem>>, vector<8x1xf32>
      tpu.vector_store %arg10[%c0_39, %c0_40], %75 {strides = array<i32>} : memref<8x1xf32, #tpu.memory_space<vmem>>, vector<8x1xf32>,
      %cst_41 = arith.constant 0.000000e+00 : f32
      %77 = vector.broadcast %cst_41 : f32 to vector<8x1xf32>
      %c0_42 = arith.constant 0 : index
      %c0_43 = arith.constant 0 : index
      %78 = vector.load %arg11[%c0_42, %c0_43] : memref<8x1xf32, #tpu.memory_space<vmem>>, vector<8x1xf32>
      tpu.vector_store %arg11[%c0_42, %c0_43], %77 {strides = array<i32>} : memref<8x1xf32, #tpu.memory_space<vmem>>, vector<8x1xf32>,
      %cst_44 = arith.constant 0.000000e+00 : f32
      %79 = vector.broadcast %cst_44 : f32 to vector<8x1xf32>
      %c0_45 = arith.constant 0 : index
      %c0_46 = arith.constant 0 : index
      %80 = vector.load %arg12[%c0_45, %c0_46] : memref<8x1xf32, #tpu.memory_space<vmem>>, vector<8x1xf32>
      tpu.vector_store %arg12[%c0_45, %c0_46], %79 {strides = array<i32>} : memref<8x1xf32, #tpu.memory_space<vmem>>, vector<8x1xf32>,
      %cst_47 = arith.constant 0.000000e+00 : f32
      %81 = vector.broadcast %cst_47 : f32 to vector<8x1xf32>
      %c0_48 = arith.constant 0 : index
      %c0_49 = arith.constant 0 : index
      %82 = vector.load %arg13[%c0_48, %c0_49] : memref<8x1xf32, #tpu.memory_space<vmem>>, vector<8x1xf32>
      tpu.vector_store %arg13[%c0_48, %c0_49], %81 {strides = array<i32>} : memref<8x1xf32, #tpu.memory_space<vmem>>, vector<8x1xf32>,
      %cst_50 = arith.constant 0.000000e+00 : f32
      %83 = vector.broadcast %cst_50 : f32 to vector<8x1xf32>
      %c0_51 = arith.constant 0 : index
      %c0_52 = arith.constant 0 : index
      %84 = vector.load %arg14[%c0_51, %c0_52] : memref<8x1xf32, #tpu.memory_space<vmem>>, vector<8x1xf32>
      tpu.vector_store %arg14[%c0_51, %c0_52], %83 {strides = array<i32>} : memref<8x1xf32, #tpu.memory_space<vmem>>, vector<8x1xf32>,
    } else {
    }
    %c0 = arith.constant 0 : index
    %c0_1 = arith.constant 0 : index
    %3 = vector.load %arg2[%c0, %c0_1] : memref<8x256xf32, #tpu.memory_space<vmem>>, vector<8x256xf32>
    %c0_2 = arith.constant 0 : index
    %c0_3 = arith.constant 0 : index
    %4 = vector.load %arg3[%c0_2, %c0_3] : memref<256x128xf32, #tpu.memory_space<vmem>>, vector<256x128xf32>
    %cst = arith.constant dense<0.000000e+00> : vector<8x128xf32>
    %5 = tpu.matmul %3, %4, %cst {dimension_numbers = #tpu.dot_dimension_numbers<[1], [0], [0], [1], [0, 0, 1, 1], [], []>} : vector<8x256xf32>, vector<256x128xf32>, vector<8x128xf32> -> vector<8x128xf32>
    %cst_4 = arith.constant 14.2857141 : f32
    %6 = vector.broadcast %cst_4 : f32 to vector<8x128xf32>
    %7 = arith.mulf %5, %6 : vector<8x128xf32>
    %c8_i32 = arith.constant 8 : i32
    %8 = arith.muli %arg0, %c8_i32 : i32
    %9 = tpu.iota {dimensions = array<i32: 0>} : vector<8x1xi32>
    %10 = vector.broadcast %8 : i32 to vector<8x1xi32>
    %11 = arith.addi %10, %9 : vector<8x1xi32>
    %c128_i32 = arith.constant 128 : i32
    %12 = arith.muli %arg1, %c128_i32 : i32
    %13 = tpu.iota {dimensions = array<i32: 1>} : vector<1x128xi32>
    %14 = vector.broadcast %12 : i32 to vector<1x128xi32>
    %15 = arith.addi %14, %13 : vector<1x128xi32>
    %16 = vector.broadcast %11 : vector<8x1xi32> to vector<8x128xi32>
    %17 = vector.broadcast %15 : vector<1x128xi32> to vector<8x128xi32>
    %18 = arith.cmpi ne, %16, %17 : vector<8x128xi32>
    %c16_i32 = arith.constant 16 : i32
    %19 = vector.broadcast %c16_i32 : i32 to vector<1x128xi32>
    %20 = arith.cmpi slt, %15, %19 : vector<1x128xi32>
    %21 = vector.broadcast %20 : vector<1x128xi1> to vector<8x128xi1>
    %22 = arith.andi %18, %21 : vector<8x128xi1>
    %c0_5 = arith.constant 0 : index
    %c0_6 = arith.constant 0 : index
    %23 = vector.load %arg4[%c0_5, %c0_6] : memref<8x1xi32, #tpu.memory_space<vmem>>, vector<8x1xi32>
    %c0_7 = arith.constant 0 : index
    %c0_8 = arith.constant 0 : index
    %24 = vector.load %arg6[%c0_7, %c0_8] : memref<1x128xi32, #tpu.memory_space<vmem>>, vector<1x128xi32>
    %25 = vector.broadcast %23 : vector<8x1xi32> to vector<8x128xi32>
    %26 = vector.broadcast %24 : vector<1x128xi32> to vector<8x128xi32>
    %27 = arith.cmpi eq, %25, %26 : vector<8x128xi32>
    %28 = arith.andi %27, %22 : vector<8x128xi1>
    %c0_9 = arith.constant 0 : index
    %c0_10 = arith.constant 0 : index
    %29 = vector.load %arg5[%c0_9, %c0_10] : memref<8x1xi32, #tpu.memory_space<vmem>>, vector<8x1xi32>
    %c0_11 = arith.constant 0 : index
    %c0_12 = arith.constant 0 : index
    %30 = vector.load %arg7[%c0_11, %c0_12] : memref<1x128xi32, #tpu.memory_space<vmem>>, vector<1x128xi32>
    %31 = vector.broadcast %29 : vector<8x1xi32> to vector<8x128xi32>
    %32 = vector.broadcast %30 : vector<1x128xi32> to vector<8x128xi32>
    %33 = arith.cmpi eq, %31, %32 : vector<8x128xi32>
    %cst_13 = arith.constant dense<true> : vector<8x128xi1>
    %34 = arith.xori %27, %cst_13 : vector<8x128xi1>
    %35 = arith.andi %22, %34 : vector<8x128xi1>
    %36 = arith.andi %35, %33 : vector<8x128xi1>
    %c0_14 = arith.constant 0 : index
    %c0_15 = arith.constant 0 : index
    %37 = vector.load %arg10[%c0_14, %c0_15] : memref<8x1xf32, #tpu.memory_space<vmem>>, vector<8x1xf32>
    %cst_16 = arith.constant 0xFF800000 : f32
    %38 = vector.shape_cast %20 : vector<1x128xi1> to vector<1x128xi1>
    %39 = vector.broadcast %38 : vector<1x128xi1> to vector<8x128xi1>
    %40 = vector.broadcast %cst_16 : f32 to vector<8x128xf32>
    %41 = arith.select %39, %7, %40 : vector<8x128xi1>, vector<8x128xf32>
    %cst_17 = arith.constant dense<0xFF800000> : vector<8xf32>
    %42 = vector.multi_reduction <maximumf>, %41, %cst_17 [1] : vector<8x128xf32> to vector<8xf32>
    %43 = vector.shape_cast %42 : vector<8xf32> to vector<8x1xf32>
    %44 = arith.maximumf %37, %43 : vector<8x1xf32>
    %45 = arith.subf %37, %44 : vector<8x1xf32>
    %46 = math.exp %45 : vector<8x1xf32>
    %47 = vector.broadcast %44 : vector<8x1xf32> to vector<8x128xf32>
    %48 = arith.subf %7, %47 : vector<8x128xf32>
    %49 = math.exp %48 : vector<8x128xf32>
    %c0_18 = arith.constant 0 : index
    %c0_19 = arith.constant 0 : index
    %50 = vector.load %arg11[%c0_18, %c0_19] : memref<8x1xf32, #tpu.memory_space<vmem>>, vector<8x1xf32>
    %51 = arith.mulf %46, %50 : vector<8x1xf32>
    %cst_20 = arith.constant 0.000000e+00 : f32
    %52 = vector.broadcast %cst_20 : f32 to vector<8x128xf32>
    %53 = arith.select %36, %49, %52 : vector<8x128xi1>, vector<8x128xf32>
    %cst_21 = arith.constant dense<0.000000e+00> : vector<8xf32>
    %54 = vector.multi_reduction <add>, %53, %cst_21 [1] : vector<8x128xf32> to vector<8xf32>
    %55 = vector.shape_cast %54 : vector<8xf32> to vector<8x1xf32>
    %56 = arith.addf %51, %55 : vector<8x1xf32>
    %c0_22 = arith.constant 0 : index
    %c0_23 = arith.constant 0 : index
    %57 = vector.load %arg11[%c0_22, %c0_23] : memref<8x1xf32, #tpu.memory_space<vmem>>, vector<8x1xf32>
    tpu.vector_store %arg11[%c0_22, %c0_23], %56 {strides = array<i32>} : memref<8x1xf32, #tpu.memory_space<vmem>>, vector<8x1xf32>,
    %c0_24 = arith.constant 0 : index
    %c0_25 = arith.constant 0 : index
    %58 = vector.load %arg10[%c0_24, %c0_25] : memref<8x1xf32, #tpu.memory_space<vmem>>, vector<8x1xf32>
    tpu.vector_store %arg10[%c0_24, %c0_25], %44 {strides = array<i32>} : memref<8x1xf32, #tpu.memory_space<vmem>>, vector<8x1xf32>,
    %59 = arith.extui %28 : vector<8x128xi1> to vector<8x128xi32>
    %60 = arith.sitofp %59 : vector<8x128xi32> to vector<8x128xf32>
    %c0_26 = arith.constant 0 : index
    %c0_27 = arith.constant 0 : index
    %61 = vector.load %arg12[%c0_26, %c0_27] : memref<8x1xf32, #tpu.memory_space<vmem>>, vector<8x1xf32>
    %62 = arith.mulf %60, %7 : vector<8x128xf32>
    %cst_28 = arith.constant dense<0.000000e+00> : vector<8xf32>
    %63 = vector.multi_reduction <add>, %62, %cst_28 [1] : vector<8x128xf32> to vector<8xf32>
    %64 = vector.shape_cast %63 : vector<8xf32> to vector<8x1xf32>
    %65 = arith.addf %61, %64 : vector<8x1xf32>
    %c0_29 = arith.constant 0 : index
    %c0_30 = arith.constant 0 : index
    %66 = vector.load %arg12[%c0_29, %c0_30] : memref<8x1xf32, #tpu.memory_space<vmem>>, vector<8x1xf32>
    tpu.vector_store %arg12[%c0_29, %c0_30], %65 {strides = array<i32>} : memref<8x1xf32, #tpu.memory_space<vmem>>, vector<8x1xf32>,
    %c0_31 = arith.constant 0 : index
    %c0_32 = arith.constant 0 : index
    %67 = vector.load %arg13[%c0_31, %c0_32] : memref<8x1xf32, #tpu.memory_space<vmem>>, vector<8x1xf32>
    %cst_33 = arith.constant dense<0.000000e+00> : vector<8xf32>
    %68 = vector.multi_reduction <add>, %60, %cst_33 [1] : vector<8x128xf32> to vector<8xf32>
    %69 = vector.shape_cast %68 : vector<8xf32> to vector<8x1xf32>
    %70 = arith.addf %67, %69 : vector<8x1xf32>
    %c0_34 = arith.constant 0 : index
    %c0_35 = arith.constant 0 : index
    %71 = vector.load %arg13[%c0_34, %c0_35] : memref<8x1xf32, #tpu.memory_space<vmem>>, vector<8x1xf32>
    tpu.vector_store %arg13[%c0_34, %c0_35], %70 {strides = array<i32>} : memref<8x1xf32, #tpu.memory_space<vmem>>, vector<8x1xf32>,
    %c0_i32_36 = arith.constant 0 : i32
    %72 = arith.cmpi eq, %arg1, %c0_i32_36 : i32
    %73 = arith.extui %72 : i1 to i32
    %c0_i32_37 = arith.constant 0 : i32
    %74 = arith.cmpi ne, %73, %c0_i32_37 : i32
    scf.if %74 {
      %c0_38 = arith.constant 0 : index
      %c0_39 = arith.constant 0 : index
      %75 = vector.load %arg11[%c0_38, %c0_39] : memref<8x1xf32, #tpu.memory_space<vmem>>, vector<8x1xf32>
      %cst_40 = arith.constant 0.000000e+00 : f32
      %76 = vector.broadcast %cst_40 : f32 to vector<8x1xf32>
      %77 = arith.cmpf oeq, %75, %76 : vector<8x1xf32>
      %78 = arith.extui %77 : vector<8x1xi1> to vector<8x1xi32>
      %79 = arith.sitofp %78 : vector<8x1xi32> to vector<8x1xf32>
      %80 = arith.addf %75, %79 : vector<8x1xf32>
      %81 = math.log %80 : vector<8x1xf32>
      %c0_41 = arith.constant 0 : index
      %c0_42 = arith.constant 0 : index
      %82 = vector.load %arg10[%c0_41, %c0_42] : memref<8x1xf32, #tpu.memory_space<vmem>>, vector<8x1xf32>
      %83 = arith.addf %82, %81 : vector<8x1xf32>
      %c0_43 = arith.constant 0 : index
      %c0_44 = arith.constant 0 : index
      %84 = vector.load %arg13[%c0_43, %c0_44] : memref<8x1xf32, #tpu.memory_space<vmem>>, vector<8x1xf32>
      %c0_45 = arith.constant 0 : index
      %c0_46 = arith.constant 0 : index
      %85 = vector.load %arg12[%c0_45, %c0_46] : memref<8x1xf32, #tpu.memory_space<vmem>>, vector<8x1xf32>
      %86 = arith.mulf %84, %83 : vector<8x1xf32>
      %87 = arith.subf %85, %86 : vector<8x1xf32>
      %88 = arith.divf %87, %84 : vector<8x1xf32>
      %cst_47 = arith.constant -1.000000e+00 : f32
      %89 = vector.broadcast %cst_47 : f32 to vector<8x1xf32>
      %90 = arith.mulf %89, %88 : vector<8x1xf32>
      %c0_48 = arith.constant 0 : index
      %c0_49 = arith.constant 0 : index
      %91 = vector.load %arg4[%c0_48, %c0_49] : memref<8x1xi32, #tpu.memory_space<vmem>>, vector<8x1xi32>
      %c-2147483648_i32 = arith.constant -2147483648 : i32
      %92 = vector.broadcast %c-2147483648_i32 : i32 to vector<8x1xi32>
      %93 = arith.cmpi ne, %91, %92 : vector<8x1xi32>
      %cst_50 = arith.constant 0.000000e+00 : f32
      %94 = vector.broadcast %cst_50 : f32 to vector<8x1xf32>
      %95 = arith.select %93, %90, %94 : vector<8x1xi1>, vector<8x1xf32>
      %c0_51 = arith.constant 0 : index
      %c0_52 = arith.constant 0 : index
      %96 = vector.load %arg9[%c0_51, %c0_52] : memref<8x1xf32, #tpu.memory_space<vmem>>, vector<8x1xf32>
      tpu.vector_store %arg9[%c0_51, %c0_52], %95 {strides = array<i32>} : memref<8x1xf32, #tpu.memory_space<vmem>>, vector<8x1xf32>,
    } else {
    }
    return
  }
  func.func @transform_0(%arg0: i32, %arg1: i32) -> (i32, i32) {
    %c0_i32 = arith.constant 0 : i32
    %c0_i32_0 = arith.constant 0 : i32
    return %arg0, %c0_i32 : i32, i32
  }
  func.func @transform_1(%arg0: i32, %arg1: i32) -> (i32, i32) {
    %c0_i32 = arith.constant 0 : i32
    %c0_i32_0 = arith.constant 0 : i32
    return %c0_i32, %arg1 : i32, i32
  }
  func.func @transform_2(%arg0: i32, %arg1: i32) -> (i32, i32) {
    %c0_i32 = arith.constant 0 : i32
    %c0_i32_0 = arith.constant 0 : i32
    return %arg0, %c0_i32 : i32, i32
  }
  func.func @transform_3(%arg0: i32, %arg1: i32) -> (i32, i32) {
    %c0_i32 = arith.constant 0 : i32
    %c0_i32_0 = arith.constant 0 : i32
    return %arg0, %c0_i32 : i32, i32
  }
  func.func @transform_4(%arg0: i32, %arg1: i32) -> (i32, i32) {
    %c0_i32 = arith.constant 0 : i32
    %c0_i32_0 = arith.constant 0 : i32
    return %c0_i32, %arg1 : i32, i32
  }
  func.func @transform_5(%arg0: i32, %arg1: i32) -> (i32, i32) {
    %c0_i32 = arith.constant 0 : i32
    %c0_i32_0 = arith.constant 0 : i32
    return %c0_i32, %arg1 : i32, i32
  }
  func.func @transform_6(%arg0: i32, %arg1: i32) -> (i32, i32) {
    %c0_i32 = arith.constant 0 : i32
    %c0_i32_0 = arith.constant 0 : i32
    return %c0_i32, %arg1 : i32, i32
  }
  func.func @transform_7(%arg0: i32, %arg1: i32) -> (i32, i32) {
    %c0_i32 = arith.constant 0 : i32
    %c0_i32_0 = arith.constant 0 : i32
    return %arg0, %c0_i32 : i32, i32
  }
}

</mosaic_0001>

<bundles_post_ra>
// kernel: tpu_custom_call.1
= control target key start
LH: loop header
LB: loop body
LE: loop exit
PB: predicated region body
PF: predicated region fallthrough
CT: control target
= control target key end

     0   :  { %12 = vsyncpa [#allocation8], 0  ;;  %s982_s24 = smov 0   ;;  %s984_s25 = smov 0   ;;  %s1104_s0 = inlined_call_operand.vmem [shape: f32[16,256], index: 0, kind: input, shape index: {}]   ;;  %s1105_s1 = inlined_call_operand.hbm [shape: f32[256,128], index: 1, kind: input, shape index: {}]   ;;  %s1106_s2 = inlined_call_operand.vmem [shape: s32[16,1], index: 2, kind: input, shape index: {}]   ;;  %s1107_s3 = inlined_call_operand.vmem [shape: s32[16,1], index: 3, kind: input, shape index: {}]   ;;  %s1108_s4 = inlined_call_operand.vmem [shape: s32[1,128], index: 4, kind: input, shape index: {}]   ;;  %s1109_s5 = inlined_call_operand.vmem [shape: s32[1,128], index: 5, kind: input, shape index: {}]   ;;  %s1110_s6 = inlined_call_operand.vmem [shape: f32[1,128], index: 6, kind: input, shape index: {}]   ;;  %s1111_s7 = inlined_call_operand.vmem [shape: f32[16,1], index: 7, kind: output, shape index: {}]  }
   0x1   :  { %s986_s26 = smov 0  }
   0x2 LB: > { %s738_s6 = sadd.s32 4294967295, %s933_s26   ;;  %s30_s27 = sadd.s32 1, %s929_s25  ;;  %s933_s26 = sphi %s986_s26, %s18_s26   ;;  %s929_s25 = sphi %s984_s25, %s1123_s25   ;;  %s925_s24 = sphi %s982_s24, %s1122_s24  }
   0x3   : > { %p32_p0 = scmp.ge.s32.totalorder %s30_s27, 2  ;;  %p740_p1 = scmp.ge.s32.totalorder %s933_s26, 1 }
   0x4   : > { %p243_p2 = scmp.lt.s32.totalorder %s933_s26, 3  ;;  %p1007_p4 = scmp.eq.s32.totalorder %s738_s6, 0 }
   0x5   : > { %s1125_s27 = smov (%p32_p0, %s30_s27), 0  ;;  %s935_s30 = smov [#allocation7]  }
   0x6   : > { %p1003_p3 = pnand %p740_p1, %p243_p2  ;;  %s257_s8 = sshll.u32 %s935_s30, 4  ;;  %s258_s8 = int_to_ptr.vmem [resolvable:$true] %s257_s8 }
   0x7   : > { %s1116_s29 = scalar_select %p1007_p4, 1, 0 }
   0x8   : > { %s1115_s28 = scalar_select %p1003_p3, 1, 0 }
   0x9   : > { %p832_p5 = pneg %p1003_p3  ;;  %s879_s12 = scalar_lea.hbm %s1105_s1, 4096 }
   0xa   : > { %p880_p7 = scmp.ne.s32.totalorder %s1105_s1, %s879_s12  ;;  %p886_p11 = scmp.lt.u32.totalorder %s879_s12, %s1105_s1 }
   0xb   : > { %p1015_p6 = pnand %p1007_p4, %p832_p5 }
   0xd   : > { %p881_p8 = pneg %p1015_p6 }
   0xf   : > { %p882_p9 = pnand %p881_p8, %p880_p7 }
  0x11   : > { %p883_p10 = pneg %p882_p9 }
  0x13   : > { %p888_p12 = pnand %p886_p11, %p883_p10 }
  0x15   : > { %891 = shalt.err (!%p888_p12)
}
  0x16   : > { %s892_s17 = scalar_lea.vmem %s258_s8, 4096  ;;  %p900_p2 = scmp.lt.s32.totalorder %s258_s8, %s258_s8 }
  0x17   : > { %p893_p13 = scmp.ne.s32.totalorder %s258_s8, %s892_s17  ;;  %p901_p5 = scmp.lt.s32.totalorder %s892_s17, %s892_s17 }
  0x19   : > { %p895_p0 = pnand %p893_p13, %p881_p8  ;;  %p902_p4 = por %p901_p5, %p900_p2 }
  0x1b   : > { %p896_p1 = pneg %p895_p0 }
  0x1d   : > { %p903_p3 = pnand %p902_p4, %p896_p1 }
  0x1f   : > { %906 = shalt.err (!%p903_p3)
}
  0x20   : > { %s936_s18 = smov 128   ;;  %s937_s19 = smov 8  }
  0x21   : > { %835 = dma.hbm_to_vmem [thread:$0]  (!%p1015_p6), %s1105_s1, 4096, %s258_s8, [#allocation8], %s936_s18, %s936_s18, %s937_s19  }
  0x22   : > { %p1118_p7 = scmp.ne.s32.totalorder %s1115_s28, 0 }
  0x23   : > { %p1119_p9 = scmp.ne.s32.totalorder (!%p1118_p7), %s1116_s29, 0 }
  0x24   : > { %313 = sbr.rel (%p1118_p7) target bundleno = 766 (0x2fe), region = 48 }
  0x2b   : > { %920 = dma.done.wait (%p1119_p9), [#allocation8], 4096  }
  0x2c   : > { %922 = vsyncadd (%p1119_p9), [#allocation8], 4294963200  ;;  %v938_v0 = vmov 0   ;;  %p361_p3 = scmp.lt.s32.totalorder %s925_s24, 1  ;;  %v415_v1 = vld [vmem:[#allocation7 + $0x80] sm:$0xff]  ;;  %v416_v2 = vld [vmem:[#allocation7 + $0x88] sm:$0xff]  ;;  %v503_v52 = vlaneseq }
  0x2d   : > { %870 = vset.pattern.permute.xlu1 %v938_v0  ;;  %869 = vset.pattern.permute.xlu0 %v938_v0  ;;  %v399_v3 = vld [vmem:[#allocation7] sm:$0xff]  ;;  %v796_v4 = vpack.c.bf16 %v416_v2, %v415_v1  ;;  %v400_v5 = vld [vmem:[#allocation7 + $0x8] sm:$0xff]  ;;  %v417_v6 = vld [vmem:[#allocation7 + $0x90] sm:$0xff]  ;;  %s753_s11 = sshll.u32 %s925_s24, 3  ;;  %vm391_vm1 = vcmask 7168   ;;  %v939_v57 = vmov -inf  }
  0x2e   : > { %s362_s22 = scalar_select %p361_p3, %s925_s24, 1  ;;  %v418_v7 = vld [vmem:[#allocation7 + $0x98] sm:$0xff]  ;;  %v798_v8 = vpack.c.bf16 %v400_v5, %v399_v3  ;;  %v401_v10 = vld [vmem:[#allocation7 + $0x10] sm:$0xff]  ;;  %v419_v12 = vld [vmem:[#allocation7 + $0xa0] sm:$0xff]  ;;  %v504_v53 = vshrl.u32 %v503_v52, 7  ;;  %v505_v54 = vstv %s753_s11  ;;  %v509_v56 = vand.u32 127, %v503_v52 }
  0x2f   : > { %v800_v9 = vpack.c.bf16 %v418_v7, %v417_v6  ;;  %v402_v11 = vld [vmem:[#allocation7 + $0x18] sm:$0xff]  ;;  %797 = vmatprep.subr.bf16.mxu0 %v796_v4  ;;  %v420_v13 = vld [vmem:[#allocation7 + $0xa8] sm:$0xff]  ;;  %v403_v16 = vld [vmem:[#allocation7 + $0x20] sm:$0xff]  ;;  %392 = vst.msk [vmem:[#allocation2] sm:$0xff] %vm391_vm1, %v939_v57  ;;  %v940_v58 = vmov 0.0   ;;  %vm941_vm6 = vmmov 1  }
  0x30   : > { %799 = vmatpush3.bf16.msra.mxu0 %v798_v8  ;;  %v802_v14 = vpack.c.bf16 %v402_v11, %v401_v10  ;;  %s760_s23 = sshll.u32 %s362_s22, 4  ;;  %v804_v15 = vpack.c.bf16 %v420_v13, %v419_v12  ;;  %v404_v17 = vld [vmem:[#allocation7 + $0x28] sm:$0xff]  ;;  %s1043_s6 = sshll.u32 %s362_s22, 3  ;;  %v421_v18 = vld [vmem:[#allocation7 + $0xb0] sm:$0xff]  ;;  %v422_v19 = vld [vmem:[#allocation7 + $0xb8] sm:$0xff]  ;;  %v506_v55 = vadd.s32 %v505_v54, %v504_v53  ;;  %393 = vst.msk [vmem:[#allocation3] sm:$0xff] %vm391_vm1, %v940_v58 }
  0x31   : > { %801 = vmatprep.subr.bf16.mxu0 %v800_v9  ;;  %s1048_s30 = scalar_lea.vmem %s1104_s0, %s760_s23  ;;  %v806_v20 = vpack.c.bf16 %v404_v17, %v403_v16  ;;  %s369_s10 = scalar_lea.vmem %s1106_s2, %s1043_s6  ;;  %v808_v21 = vpack.c.bf16 %v422_v19, %v421_v18  ;;  %v405_v22 = vld [vmem:[#allocation7 + $0x30] sm:$0xff]  ;;  %v406_v23 = vld [vmem:[#allocation7 + $0x38] sm:$0xff]  ;;  %v423_v24 = vld [vmem:[#allocation7 + $0xc0] sm:$0xff]  ;;  %394 = vst.msk [vmem:[#allocation4] sm:$0xff] %vm391_vm1, %v940_v58  ;;  %vm513_vm2 = vcmp.lt.s32.totalorder %v509_v56, 16 }
  0x32   : > { %v424_v25 = vld [vmem:[#allocation7 + $0xc8] sm:$0xff]  ;;  %v1055_v27 = vld [vmem:[%s369_s10] sm:$0xff]  ;;  %v810_v28 = vpack.c.bf16 %v406_v23, %v405_v22  ;;  %v425_v32 = vld [vmem:[#allocation7 + $0xd0] sm:$0xff]  ;;  %vm512_vm0 = vcmp.ne.s32.totalorder %v506_v55, %v509_v56  ;;  %395 = vst.msk [vmem:[#allocation5] sm:$0xff] %vm391_vm1, %v940_v58  ;;  %s373_s13 = scalar_lea.vmem %s1107_s3, %s1043_s6  ;;  %s386_s20 = scalar_lea.vmem %s1111_s7, %s1043_s6 }
  0x33   : > { %v398_v26 = vld [vmem:[%s1048_s30 + $0x8] sm:$0xff]  ;;  %520 = vperm.xlu1 %870, %v1055_v27   ;;  %v812_v29 = vpack.c.bf16 %v424_v25, %v423_v24  ;;  %v407_v30 = vld [vmem:[#allocation7 + $0x40] sm:$0xff]  ;;  %v426_v33 = vld [vmem:[#allocation7 + $0xd8] sm:$0xff]  ;;  %vm599_vm12 = vcmp.ne.s32.totalorder %v1055_v27, 2147483648 }
  0x34   : > { %803 = vmatpush3.bf16.msra.mxu0 %v802_v14  ;;  %495 = vmatprep.mubr.f32.mxu0 %v398_v26  ;;  %v408_v31 = vld [vmem:[#allocation7 + $0x48] sm:$0xff]  ;;  %v816_v35 = vpack.c.bf16 %v426_v33, %v425_v32  ;;  %v409_v36 = vld [vmem:[#allocation7 + $0x50] sm:$0xff]  ;;  %v410_v37 = vld [vmem:[#allocation7 + $0x58] sm:$0xff] }
  0x35   : > { %805 = vmatprep.subr.bf16.mxu0 %v804_v15  ;;  %v814_v34 = vpack.c.bf16 %v408_v31, %v407_v30  ;;  %v427_v38 = vld [vmem:[#allocation7 + $0xe0] sm:$0xff]  ;;  %v428_v39 = vld [vmem:[#allocation7 + $0xe8] sm:$0xff]  ;;  %v818_v40 = vpack.c.bf16 %v410_v37, %v409_v36  ;;  %v429_v44 = vld [vmem:[#allocation7 + $0xf0] sm:$0xff] }
  0x36   : > { %v820_v41 = vpack.c.bf16 %v428_v39, %v427_v38  ;;  %v411_v42 = vld [vmem:[#allocation7 + $0x60] sm:$0xff]  ;;  %v412_v43 = vld [vmem:[#allocation7 + $0x68] sm:$0xff]  ;;  %v430_v45 = vld [vmem:[#allocation7 + $0xf8] sm:$0xff] }
  0x37   : > { %v822_v46 = vpack.c.bf16 %v412_v43, %v411_v42  ;;  %v824_v47 = vpack.c.bf16 %v430_v45, %v429_v44  ;;  %v413_v48 = vld [vmem:[#allocation7 + $0x70] sm:$0xff]  ;;  %v414_v49 = vld [vmem:[#allocation7 + $0x78] sm:$0xff]  ;;  %v397_v51 = vld [vmem:[%s1048_s30] sm:$0xff] }
  0x38   : > { %807 = vmatpush3.bf16.msra.mxu0 %v806_v20  ;;  %v826_v50 = vpack.c.bf16 %v414_v49, %v413_v48  ;;  %v528_v0 = vld [vmem:[%s373_s13] sm:$0xff]  ;;  %vm1075_vm4 = vmand %vm512_vm0, %vm513_vm2  ;;  %v568_v17 = vld [vmem:[#allocation4] sm:$0xff] }
  0x39   : > { %809 = vmatprep.subr.bf16.mxu0 %v808_v21  ;;  %531 = vperm.xlu1 %870, %v528_v0   ;;  %v541_v1 = vld [vmem:[#allocation2] sm:$0xff]  ;;  %v557_v22 = vld [vmem:[#allocation3] sm:$0xff]  ;;  %v574_v26 = vld [vmem:[#allocation5] sm:$0xff] }
  0x3a   : > { %v754_v5 = vld [vmem:[%s1108_s4] ss:$0 sm:$0xff] }
  0x3b   : > { %v755_v13 = vld [vmem:[%s1109_s5] ss:$0 sm:$0xff] }
  0x3c   : > { %811 = vmatpush3.bf16.msra.mxu0 %v810_v28 }
  0x3d   : > { %813 = vmatprep.subr.bf16.mxu0 %v812_v29 }
  0x40   : > { %815 = vmatpush3.bf16.msra.mxu0 %v814_v34 }
  0x41   : > { %817 = vmatprep.subr.bf16.mxu0 %v816_v35 }
  0x44   : > { %819 = vmatpush3.bf16.msra.mxu0 %v818_v40 }
  0x45   : > { %821 = vmatprep.subr.bf16.mxu0 %v820_v41 }
  0x48   : > { %823 = vmatpush3.bf16.msra.mxu0 %v822_v46 }
  0x49   : > { %825 = vmatprep.subr.bf16.mxu0 %v824_v47 }
  0x4c   : > { %827 = vmatpush3.bf16.msra.mxu0 %v826_v50 }
  0x4f   : > { %496 = vmatmul.mubr.f32.vlgmr.msra.gmra.mrb[0].mxu0 %v397_v51 }
  0xb2   : > { %v521_v6 = vpop.permute.xlu1 %520 }
  0xb3   : > { %vm526_vm3 = vcmp.eq.s32.totalorder %v521_v6, %v754_v5 }
  0xb4   : > { %vm527_vm5 = vmand %vm526_vm3, %vm1075_vm4 }
  0xb5   : > { %v756_v8 = vsel %vm527_vm5, 1.0, %v940_v58  ;;  %vm538_vm7 = vmxor %vm526_vm3, %vm941_vm6 }
  0xb6   : > { %vm539_vm9 = vmand %vm1075_vm4, %vm538_vm7 }
  0xb8   : > { %v532_v14 = vpop.permute.xlu1 %531 }
  0xb9   : > { %vm537_vm8 = vcmp.eq.s32.totalorder %v532_v14, %v755_v13 }
  0xba   : > { %vm540_vm10 = vmand %vm539_vm9, %vm537_vm8 }
 0x122   : > { %v793_v59 = vpop.f32.mrb[0].mxu0 }
 0x123   : > { %v794_v60 = vpop.f32.mrb[1].mxu0 }
 0x124   : > { %v795_v61 = vadd.f32 %v794_v60, %v793_v59 }
 0x126   : > { %v501_v62 = vmul.f32 14.285714, %v795_v61 }
 0x128   : > { %v542_v63 = vsel %vm513_vm2, %v501_v62, -inf  ;;  %v569_v9 = vmul.f32 %v756_v8, %v501_v62 }
 0x129   : > { %543 = vmax.xlane.f32.xlu0 %v542_v63 }
 0x1b6   : > { %v544_v2 = vpop.xlane.xlu0 %543 }
 0x1b7   : > { %v545_v3 = vmax.f32 %v541_v1, %v544_v2 }
 0x1b9   : > { %v546_v4 = vsub.f32 %v541_v1, %v545_v3  ;;  %565 = vst.msk [vmem:[#allocation2] sm:$0xff] %vm391_vm1, %v545_v3  ;;  %551 = vperm.xlu0 %869, %v545_v3  }
 0x1bb   : > { %v547_v20 = vmul.f32 1.442695, %v546_v4 }
 0x1c0   : > { %v589_v36 = vld [vmem:[#allocation2] sm:$0xff] }
 0x1d8   : > { %570 = vadd.xlane.f32.xlu0 %v569_v9 }
 0x238   : > { %v552_v10 = vpop.permute.xlu0 %551 }
 0x239   : > { %v554_v11 = vsub.f32 %v501_v62, %v552_v10 }
 0x23b   : > { %v555_v12 = vmul.f32 1.442695, %v554_v11 }
 0x23d   : > { %871 = vpow2.f32 %v555_v12 }
 0x23e   : > { %873 = vpow2.f32 %v547_v20 }
 0x247   : > { %v872_v15 = vpop.eup %871 }
 0x248   : > { %v559_v16 = vsel %vm540_vm10, %v872_v15, 0.0  ;;  %v874_v21 = vpop.eup %873 }
 0x249   : > { %560 = vadd.xlane.f32.xlu1 %v559_v16  ;;  %v558_v23 = vmul.f32 %v874_v21, %v557_v22 }
 0x24d   : > { %575 = vadd.xlane.f32.xlu1 %v756_v8 }
 0x265   : > { %v571_v18 = vpop.xlane.xlu0 %570 }
 0x266   : > { %v572_v19 = vadd.f32 %v571_v18, %v568_v17 }
 0x268   : > { %573 = vst.msk [vmem:[#allocation4] sm:$0xff] %vm391_vm1, %v572_v19 }
 0x26f   : > { %v592_v39 = vld [vmem:[#allocation4] sm:$0xff] }
 0x2d6   : > { %v561_v24 = vpop.xlane.xlu1 %560 }
 0x2d7   : > { %v562_v25 = vadd.f32 %v561_v24, %v558_v23 }
 0x2d9   : > { %564 = vst.msk [vmem:[#allocation3] sm:$0xff] %vm391_vm1, %v562_v25 }
 0x2da   : > { %v576_v28 = vpop.xlane.xlu1 %575 }
 0x2db   : > { %v577_v29 = vadd.f32 %v576_v28, %v574_v26 }
 0x2dd   : > { %578 = vst.msk [vmem:[#allocation5] sm:$0xff] %vm391_vm1, %v577_v29 }
 0x2e0   : > { %v582_v30 = vld [vmem:[#allocation3] sm:$0xff] }
 0x2e1   : > { %vm583_vm11 = vcmp.eq.f32.partialorder %v582_v30, 0.0 }
 0x2e2   : > { %v757_v31 = vsel %vm583_vm11, 1.0, %v940_v58 }
 0x2e3   : > { %v586_v32 = vadd.f32 %v757_v31, %v582_v30 }
 0x2e4   : > { %v591_v33 = vld [vmem:[#allocation5] sm:$0xff] }
 0x2e5   : > { %875 = vlog2.f32 %v586_v32 }
 0x2e6   : > { %877 = vrcp.f32 %v591_v33 }
 0x2ef   : > { %v876_v34 = vpop.eup %875 }
 0x2f0   : > { %v588_v35 = vmul.f32 0.6931472, %v876_v34  ;;  %v878_v41 = vpop.eup %877 }
 0x2f2   : > { %v590_v37 = vadd.f32 %v589_v36, %v588_v35 }
 0x2f4   : > { %v593_v38 = vmul.f32 %v591_v33, %v590_v37 }
 0x2f6   : > { %v594_v40 = vsub.f32 %v592_v39, %v593_v38 }
 0x2f8   : > { %v596_v42 = vmul.f32 %v878_v41, %v594_v40 }
 0x2fa   : > { %v597_v43 = vmul.f32 -1.0, %v596_v42 }
 0x2fc   : > { %v600_v44 = vsel %vm599_vm12, %v597_v43, 0.0 }
 0x2fd   : > { %601 = vst.msk [vmem:[%s386_s20] sm:$0xff] %vm391_vm1, %v600_v44 }
 0x2fe PF: > { %s18_s26 = sadd.s32 1, %s933_s26   ;;  %s1122_s24 = smov %s929_s25 }
 0x2ff   : > { %p15_p4 = scmp.ge.s32.totalorder %s18_s26, 4   ;;  %s1123_s25 = smov %s1125_s27 }
 0x301   :  { %17 = sbr.rel (!%p15_p4) target bundleno = 2 (0x2), region = 107 }
 0x308   :  { %621 = vsyncpa [#allocation8], 1 }
 0x309   :  { %623 = vsyncpa [#allocation8 + $0x1], 1 }

</bundles_post_ra>
